<compile_context>
chip_gen: v6e
topology: v6e:2x2x1
jax: 0.10.0
libtpu: 0.0.40
codegen_flags: <defaults>
</compile_context>

<pallas_src>
import numpy as np
import jax
import jax.numpy as jnp
from jax.experimental import pallas as pl
from jax.experimental.pallas import tpu as pltpu


# ---------------------------------------------------------------------------
# In-kernel helpers (all operate on values; no scratch refs)
# ---------------------------------------------------------------------------
def _conv3x3_relu(p, w_band, b_row):
    """3x3 SAME conv + bias + ReLU via one banded row-matmul.

    p:      (H, W*Cin) activation, lane order (w, ci)  [w-major, ci-minor]
    w_band: (3*W*Cin, W*Cout) bf16 banded weight, rows ordered (ky, x_col, ci),
            lanes ordered (w_parity, w_pair, co)
    b_row:  (1, W*Cout) f32 bias
    returns (H, W*Cout) f32, lanes ordered (w_parity, w_pair, co)
    """
    H, WC = p.shape
    z = jnp.zeros((1, WC), p.dtype)
    cp = jnp.concatenate([z, p, z], axis=0)                    # zero pad in H
    lhs = jnp.concatenate([cp[0:H], cp[1:H + 1], cp[2:H + 2]], axis=1)
    y = jnp.dot(lhs.astype(jnp.bfloat16), w_band,
                preferred_element_type=jnp.float32) + b_row
    return jnp.maximum(y, 0.0)


def _maxpool2x2(y):
    """2x2 / stride-2 max pool of y (H, W*Cout), lanes (w_parity, w_pair, co).

    W direction: even/odd w live in the two 128-aligned lane halves -> free
    split + max.  H direction: decimation as two tiny 0/1 selection matmuls
    (avoids strided sublane slices / relayouts; MXU has plenty of slack).
    Returns (H//2, (W//2)*Cout) with lane order (w', co).
    """
    H, L = y.shape
    yw = jnp.maximum(y[:, :L // 2], y[:, L // 2:])             # W pairs
    rows = jax.lax.broadcasted_iota(jnp.int32, (H // 2, H), 0)
    cols = jax.lax.broadcasted_iota(jnp.int32, (H // 2, H), 1)
    sel_e = jnp.where(cols == 2 * rows, 1.0, 0.0)
    sel_o = jnp.where(cols == 2 * rows + 1, 1.0, 0.0)
    pe = jnp.dot(sel_e, yw, preferred_element_type=jnp.float32)
    po = jnp.dot(sel_o, yw, preferred_element_type=jnp.float32)
    return jnp.maximum(pe, po)                                 # H pairs


# ---------------------------------------------------------------------------
# Fused kernel: one sample per grid step, whole network in one body
# ---------------------------------------------------------------------------
def fused_convnet_kernel(x_ref, w1_ref, b1_ref, w2_ref, b2_ref,
                         w3_ref, b3_ref, wfc_ref, bfc_ref, out_ref):
    x = x_ref[0]                                         # (16, 16): rows=h, lanes=w (Cin=1)

    # layer 1: conv 1->16 on 16x16, relu, 2x2 max pool   -> (8, 8*16 = 128)
    y1 = _conv3x3_relu(x, w1_ref[...], b1_ref[...])      # (16, 256)
    p1 = _maxpool2x2(y1)                                 # (8, 128)

    # layer 2: conv 16->32 on 8x8, relu, 2x2 max pool    -> (4, 4*32 = 128)
    y2 = _conv3x3_relu(p1, w2_ref[...], b2_ref[...])     # (8, 256)
    p2 = _maxpool2x2(y2)                                 # (4, 128)

    # layer 3: conv 32->64 on 4x4, relu.  Its 2x2 max pool followed by
    # AdaptiveMaxPool2d(1) is a global max over the 4x4 positions.
    y3 = _conv3x3_relu(p2, w3_ref[...], b3_ref[...])     # (4, 256), lanes (wpar, wpair, c)
    L = y3.shape[1]
    m = jnp.maximum(y3[:, :L // 2], y3[:, L // 2:])      # fold w parity -> (4, 128)
    m = jnp.maximum(m[:, :L // 4], m[:, L // 4:])        # fold w pair   -> (4, 64)
    feat = jnp.max(m, axis=0, keepdims=True)             # fold h        -> (1, 64)

    # classifier head (output lanes padded to 128 in the wrapper)
    res = (jnp.dot(feat.astype(jnp.bfloat16), wfc_ref[...],
                   preferred_element_type=jnp.float32) + bfc_ref[...])
    out_ref[0] = res


# ---------------------------------------------------------------------------
# Wrapper: weight re-packing (pure layout plumbing) + pallas_call
# ---------------------------------------------------------------------------
def _banded_conv_weight(w_oihw, w_in):
    """(Cout,Cin,3,3) torch conv weight -> (3*w_in*Cin, w_in*Cout) banded matrix.

    Row (contraction) index: ky*(w_in*Cin) + x_col*Cin + ci  -- matches the
      in-kernel LHS built as concat_lanes(rows h-1, h, h+1).
    Lane (output) index: w_par*((w_in//2)*Cout) + w_pair*Cout + co with
      w = 2*w_pair + w_par (even-w first -> free lane-split W pooling).
    Taps that would read outside [0, w_in) are simply absent (SAME zero pad).
    """
    cout, cin, _, _ = w_oihw.shape
    # Static tap structure: T[x_col, kx, w] = 1 iff x_col == w + kx - 1.
    xc = np.arange(w_in)[:, None, None]
    kx = np.arange(3)[None, :, None]
    wo = np.arange(w_in)[None, None, :]
    t = jnp.asarray((xc == wo + kx - 1).astype(np.float32))        # (w_in, 3, w_in)
    # r5[ky, x_col, ci, w, co] = sum_kx T[x_col,kx,w] * w[co,ci,ky,kx]
    r5 = jnp.einsum("vxw,oiyx->yviwo", t, w_oihw.astype(jnp.float32))
    r6 = r5.reshape(3, w_in, cin, w_in // 2, 2, cout)               # w -> (w_pair, w_par)
    r6 = jnp.transpose(r6, (0, 1, 2, 4, 3, 5))                      # (.., w_par, w_pair, co)
    return r6.reshape(3 * w_in * cin, w_in * cout).astype(jnp.bfloat16)


def _tiled_bias(b, w_in):
    # bias per output channel, tiled over the W lane groups (order-independent).
    return jnp.tile(b, w_in).reshape(1, -1).astype(jnp.float32)


def _full_spec(shape):
    nd = len(shape)
    return pl.BlockSpec(shape, lambda i, _nd=nd: (0,) * _nd)


@jax.jit
def flexible_convnet_forward(x_nchw, params):
    x = x_nchw[:, 0, :, :].astype(jnp.float32)            # (N, 16, 16), Cin == 1
    N = x.shape[0]
    (w1, b1), (w2, b2), (w3, b3) = params["convs"]

    w1b = _banded_conv_weight(w1, 16)                     # (48, 256)  bf16
    w2b = _banded_conv_weight(w2, 8)                      # (384, 256) bf16
    w3b = _banded_conv_weight(w3, 4)                      # (384, 256) bf16
    b1r, b2r, b3r = _tiled_bias(b1, 16), _tiled_bias(b2, 8), _tiled_bias(b3, 4)

    num_classes = params["fc_w"].shape[1]
    ncp = -(-num_classes // 128) * 128                    # lane-dense head (>=128)
    wfc = jnp.zeros((params["fc_w"].shape[0], ncp), jnp.float32)
    wfc = wfc.at[:, :num_classes].set(params["fc_w"]).astype(jnp.bfloat16)
    bfc = jnp.zeros((1, ncp), jnp.float32).at[0, :num_classes].set(params["fc_b"])

    inputs = (x, w1b, b1r, w2b, b2r, w3b, b3r, wfc, bfc)
    in_specs = [pl.BlockSpec((1, 16, 16), lambda i: (i, 0, 0))]
    in_specs += [_full_spec(a.shape) for a in inputs[1:]]

    out = pl.pallas_call(
        fused_convnet_kernel,
        out_shape=jax.ShapeDtypeStruct((N, 1, ncp), jnp.float32),
        grid=(N,),                                         # one sample per step
        in_specs=in_specs,
        out_specs=pl.BlockSpec((1, 1, ncp), lambda i: (i, 0, 0)),
        compiler_params=pltpu.CompilerParams(
            dimension_semantics=("parallel",)),
    )(*inputs)
    return out[:, 0, :num_classes]


# ---------------------------------------------------------------------------
# Deterministic parameter init (shapes from FlexibleConvNet.__init__, N=64)
# ---------------------------------------------------------------------------
def init_params(key, num_classes=10, n_feat=64):
    keys = jax.random.split(key, 8)

    def conv_p(kw, kb, cin, cout):
        w = 0.1 * jax.random.normal(kw, (cout, cin, 3, 3), jnp.float32)
        b = 0.1 * jax.random.normal(kb, (cout,), jnp.float32)
        return w, b

    convs = [
        conv_p(keys[0], keys[1], 1, 16),
        conv_p(keys[2], keys[3], 16, 32),
        conv_p(keys[4], keys[5], 32, n_feat),
    ]
    fc_w = 0.1 * jax.random.normal(keys[6], (n_feat, num_classes), jnp.float32)
    fc_b = 0.1 * jax.random.normal(keys[7], (num_classes,), jnp.float32)
    return {"convs": convs, "fc_w": fc_w, "fc_b": fc_b}


# Pure-JAX reference (sanity check of the fused Pallas kernel).
def ref_forward(x_nchw, params):
    x = jnp.transpose(x_nchw, (0, 2, 3, 1))
    for (w, b) in params["convs"]:
        y = jax.lax.conv_general_dilated(
            x, jnp.transpose(w, (2, 3, 1, 0)), (1, 1), "SAME",
            dimension_numbers=("NHWC", "HWIO", "NHWC")) + b
        y = jnp.maximum(y, 0.0)
        x = jax.lax.reduce_window(y, -jnp.inf, jax.lax.max,
                                  (1, 2, 2, 1), (1, 2, 2, 1), "VALID")
    feat = jnp.max(x, axis=(1, 2))
    return feat @ params["fc_w"] + params["fc_b"]


if __name__ == "__main__":
    key = jax.random.PRNGKey(0)
    pkey, xkey = jax.random.split(key)
    params = init_params(pkey)

    # PyTorch-style NCHW input: batch=2, 1 channel, 16x16 spatial.
    x = jax.random.normal(xkey, (2, 1, 16, 16), jnp.float32)

    out = jax.block_until_ready(flexible_convnet_forward(x, params))
    assert out.shape == (2, 10), out.shape

    ref = jax.block_until_ready(ref_forward(x, params))
    assert jnp.allclose(out, ref, atol=5e-2, rtol=5e-2), (out, ref)

    print("KERNEL_OK")
</pallas_src>

<mosaic_0001>
module attributes {stable_mosaic.version = 11 : i64} {
  func.func @fused_convnet_kernel(%arg0: i32, %arg1: memref<1x16x16xf32, #tpu.memory_space<vmem>>, %arg2: memref<48x256xbf16, #tpu.memory_space<vmem>>, %arg3: memref<1x256xf32, #tpu.memory_space<vmem>>, %arg4: memref<384x256xbf16, #tpu.memory_space<vmem>>, %arg5: memref<1x256xf32, #tpu.memory_space<vmem>>, %arg6: memref<384x256xbf16, #tpu.memory_space<vmem>>, %arg7: memref<1x256xf32, #tpu.memory_space<vmem>>, %arg8: memref<64x128xbf16, #tpu.memory_space<vmem>>, %arg9: memref<1x128xf32, #tpu.memory_space<vmem>>, %arg10: memref<1x1x128xf32, #tpu.memory_space<vmem>>) attributes {dimension_semantics = [#tpu.dimension_semantics<parallel>], iteration_bounds = array<i64: 2>, scalar_prefetch = 0 : i64, scratch_operands = 0 : i64, tpu.core_type = #tpu.core_type<tc>, window_params = [{transform_indices = @transform_0, window_bounds = array<i64: 1, 16, 16>}, {pipeline_mode = #tpu.pipeline_mode<synchronous>, transform_indices = @transform_1, window_bounds = array<i64: 48, 256>}, {pipeline_mode = #tpu.pipeline_mode<synchronous>, transform_indices = @transform_2, window_bounds = array<i64: 1, 256>}, {pipeline_mode = #tpu.pipeline_mode<synchronous>, transform_indices = @transform_3, window_bounds = array<i64: 384, 256>}, {pipeline_mode = #tpu.pipeline_mode<synchronous>, transform_indices = @transform_4, window_bounds = array<i64: 1, 256>}, {pipeline_mode = #tpu.pipeline_mode<synchronous>, transform_indices = @transform_5, window_bounds = array<i64: 384, 256>}, {pipeline_mode = #tpu.pipeline_mode<synchronous>, transform_indices = @transform_6, window_bounds = array<i64: 1, 256>}, {pipeline_mode = #tpu.pipeline_mode<synchronous>, transform_indices = @transform_7, window_bounds = array<i64: 64, 128>}, {pipeline_mode = #tpu.pipeline_mode<synchronous>, transform_indices = @transform_8, window_bounds = array<i64: 1, 128>}, {transform_indices = @transform_9, window_bounds = array<i64: 1, 1, 128>}]} {
    %c0 = arith.constant 0 : index
    %c0_0 = arith.constant 0 : index
    %c0_1 = arith.constant 0 : index
    %0 = vector.load %arg1[%c0, %c0_0, %c0_1] : memref<1x16x16xf32, #tpu.memory_space<vmem>>, vector<1x16x16xf32>
    %1 = vector.shape_cast %0 : vector<1x16x16xf32> to vector<16x16xf32>
    %c0_2 = arith.constant 0 : index
    %c0_3 = arith.constant 0 : index
    %2 = vector.load %arg2[%c0_2, %c0_3] : memref<48x256xbf16, #tpu.memory_space<vmem>>, vector<48x256xbf16>
    %c0_4 = arith.constant 0 : index
    %c0_5 = arith.constant 0 : index
    %3 = vector.load %arg3[%c0_4, %c0_5] : memref<1x256xf32, #tpu.memory_space<vmem>>, vector<1x256xf32>
    %cst = arith.constant 0.000000e+00 : f32
    %4 = vector.broadcast %cst : f32 to vector<1x16xf32>
    %5 = tpu.concatenate %4, %1, %4 in 0 : vector<1x16xf32>, vector<16x16xf32>, vector<1x16xf32> -> vector<18x16xf32>
    %6 = vector.extract_strided_slice %5 {offsets = [0, 0], sizes = [16, 16], strides = [1, 1]} : vector<18x16xf32> to vector<16x16xf32>
    %7 = vector.extract_strided_slice %5 {offsets = [1, 0], sizes = [16, 16], strides = [1, 1]} : vector<18x16xf32> to vector<16x16xf32>
    %8 = vector.extract_strided_slice %5 {offsets = [2, 0], sizes = [16, 16], strides = [1, 1]} : vector<18x16xf32> to vector<16x16xf32>
    %9 = tpu.concatenate %6, %7, %8 in 1 : vector<16x16xf32>, vector<16x16xf32>, vector<16x16xf32> -> vector<16x48xf32>
    %10 = arith.truncf %9 : vector<16x48xf32> to vector<16x48xbf16>
    %cst_6 = arith.constant dense<0.000000e+00> : vector<16x256xf32>
    %11 = tpu.matmul %10, %2, %cst_6 {dimension_numbers = #tpu.dot_dimension_numbers<[1], [0], [0], [1], [0, 0, 1, 1], [], []>} : vector<16x48xbf16>, vector<48x256xbf16>, vector<16x256xf32> -> vector<16x256xf32>
    %12 = vector.broadcast %3 : vector<1x256xf32> to vector<16x256xf32>
    %13 = arith.addf %11, %12 : vector<16x256xf32>
    %cst_7 = arith.constant 0.000000e+00 : f32
    %14 = vector.broadcast %cst_7 : f32 to vector<16x256xf32>
    %15 = arith.maximumf %13, %14 : vector<16x256xf32>
    %16 = vector.extract_strided_slice %15 {offsets = [0, 0], sizes = [16, 128], strides = [1, 1]} : vector<16x256xf32> to vector<16x128xf32>
    %17 = vector.extract_strided_slice %15 {offsets = [0, 128], sizes = [16, 128], strides = [1, 1]} : vector<16x256xf32> to vector<16x128xf32>
    %18 = arith.maximumf %16, %17 : vector<16x128xf32>
    %19 = tpu.iota {dimensions = array<i32: 0>} : vector<8x16xi32>
    %20 = tpu.iota {dimensions = array<i32: 1>} : vector<8x16xi32>
    %c2_i32 = arith.constant 2 : i32
    %21 = vector.broadcast %c2_i32 : i32 to vector<8x16xi32>
    %22 = arith.muli %21, %19 : vector<8x16xi32>
    %23 = arith.cmpi eq, %20, %22 : vector<8x16xi32>
    %cst_8 = arith.constant 1.000000e+00 : f32
    %cst_9 = arith.constant 0.000000e+00 : f32
    %24 = vector.broadcast %cst_8 : f32 to vector<8x16xf32>
    %25 = vector.broadcast %cst_9 : f32 to vector<8x16xf32>
    %26 = arith.select %23, %24, %25 : vector<8x16xi1>, vector<8x16xf32>
    %c2_i32_10 = arith.constant 2 : i32
    %27 = vector.broadcast %c2_i32_10 : i32 to vector<8x16xi32>
    %28 = arith.muli %27, %19 : vector<8x16xi32>
    %c1_i32 = arith.constant 1 : i32
    %29 = vector.broadcast %c1_i32 : i32 to vector<8x16xi32>
    %30 = arith.addi %28, %29 : vector<8x16xi32>
    %31 = arith.cmpi eq, %20, %30 : vector<8x16xi32>
    %cst_11 = arith.constant 1.000000e+00 : f32
    %cst_12 = arith.constant 0.000000e+00 : f32
    %32 = vector.broadcast %cst_11 : f32 to vector<8x16xf32>
    %33 = vector.broadcast %cst_12 : f32 to vector<8x16xf32>
    %34 = arith.select %31, %32, %33 : vector<8x16xi1>, vector<8x16xf32>
    %cst_13 = arith.constant dense<0.000000e+00> : vector<8x128xf32>
    %35 = tpu.matmul %26, %18, %cst_13 {dimension_numbers = #tpu.dot_dimension_numbers<[1], [0], [0], [1], [0, 0, 1, 1], [], []>} : vector<8x16xf32>, vector<16x128xf32>, vector<8x128xf32> -> vector<8x128xf32>
    %cst_14 = arith.constant dense<0.000000e+00> : vector<8x128xf32>
    %36 = tpu.matmul %34, %18, %cst_14 {dimension_numbers = #tpu.dot_dimension_numbers<[1], [0], [0], [1], [0, 0, 1, 1], [], []>} : vector<8x16xf32>, vector<16x128xf32>, vector<8x128xf32> -> vector<8x128xf32>
    %37 = arith.maximumf %35, %36 : vector<8x128xf32>
    %c0_15 = arith.constant 0 : index
    %c0_16 = arith.constant 0 : index
    %38 = vector.load %arg4[%c0_15, %c0_16] : memref<384x256xbf16, #tpu.memory_space<vmem>>, vector<384x256xbf16>
    %c0_17 = arith.constant 0 : index
    %c0_18 = arith.constant 0 : index
    %39 = vector.load %arg5[%c0_17, %c0_18] : memref<1x256xf32, #tpu.memory_space<vmem>>, vector<1x256xf32>
    %cst_19 = arith.constant 0.000000e+00 : f32
    %40 = vector.broadcast %cst_19 : f32 to vector<1x128xf32>
    %41 = tpu.concatenate %40, %37, %40 in 0 : vector<1x128xf32>, vector<8x128xf32>, vector<1x128xf32> -> vector<10x128xf32>
    %42 = vector.extract_strided_slice %41 {offsets = [0, 0], sizes = [8, 128], strides = [1, 1]} : vector<10x128xf32> to vector<8x128xf32>
    %43 = vector.extract_strided_slice %41 {offsets = [1, 0], sizes = [8, 128], strides = [1, 1]} : vector<10x128xf32> to vector<8x128xf32>
    %44 = vector.extract_strided_slice %41 {offsets = [2, 0], sizes = [8, 128], strides = [1, 1]} : vector<10x128xf32> to vector<8x128xf32>
    %45 = tpu.concatenate %42, %43, %44 in 1 : vector<8x128xf32>, vector<8x128xf32>, vector<8x128xf32> -> vector<8x384xf32>
    %46 = arith.truncf %45 : vector<8x384xf32> to vector<8x384xbf16>
    %cst_20 = arith.constant dense<0.000000e+00> : vector<8x256xf32>
    %47 = tpu.matmul %46, %38, %cst_20 {dimension_numbers = #tpu.dot_dimension_numbers<[1], [0], [0], [1], [0, 0, 1, 1], [], []>} : vector<8x384xbf16>, vector<384x256xbf16>, vector<8x256xf32> -> vector<8x256xf32>
    %48 = vector.broadcast %39 : vector<1x256xf32> to vector<8x256xf32>
    %49 = arith.addf %47, %48 : vector<8x256xf32>
    %cst_21 = arith.constant 0.000000e+00 : f32
    %50 = vector.broadcast %cst_21 : f32 to vector<8x256xf32>
    %51 = arith.maximumf %49, %50 : vector<8x256xf32>
    %52 = vector.extract_strided_slice %51 {offsets = [0, 0], sizes = [8, 128], strides = [1, 1]} : vector<8x256xf32> to vector<8x128xf32>
    %53 = vector.extract_strided_slice %51 {offsets = [0, 128], sizes = [8, 128], strides = [1, 1]} : vector<8x256xf32> to vector<8x128xf32>
    %54 = arith.maximumf %52, %53 : vector<8x128xf32>
    %55 = tpu.iota {dimensions = array<i32: 0>} : vector<4x8xi32>
    %56 = tpu.iota {dimensions = array<i32: 1>} : vector<4x8xi32>
    %c2_i32_22 = arith.constant 2 : i32
    %57 = vector.broadcast %c2_i32_22 : i32 to vector<4x8xi32>
    %58 = arith.muli %57, %55 : vector<4x8xi32>
    %59 = arith.cmpi eq, %56, %58 : vector<4x8xi32>
    %cst_23 = arith.constant 1.000000e+00 : f32
    %cst_24 = arith.constant 0.000000e+00 : f32
    %60 = vector.broadcast %cst_23 : f32 to vector<4x8xf32>
    %61 = vector.broadcast %cst_24 : f32 to vector<4x8xf32>
    %62 = arith.select %59, %60, %61 : vector<4x8xi1>, vector<4x8xf32>
    %c2_i32_25 = arith.constant 2 : i32
    %63 = vector.broadcast %c2_i32_25 : i32 to vector<4x8xi32>
    %64 = arith.muli %63, %55 : vector<4x8xi32>
    %c1_i32_26 = arith.constant 1 : i32
    %65 = vector.broadcast %c1_i32_26 : i32 to vector<4x8xi32>
    %66 = arith.addi %64, %65 : vector<4x8xi32>
    %67 = arith.cmpi eq, %56, %66 : vector<4x8xi32>
    %cst_27 = arith.constant 1.000000e+00 : f32
    %cst_28 = arith.constant 0.000000e+00 : f32
    %68 = vector.broadcast %cst_27 : f32 to vector<4x8xf32>
    %69 = vector.broadcast %cst_28 : f32 to vector<4x8xf32>
    %70 = arith.select %67, %68, %69 : vector<4x8xi1>, vector<4x8xf32>
    %cst_29 = arith.constant dense<0.000000e+00> : vector<4x128xf32>
    %71 = tpu.matmul %62, %54, %cst_29 {dimension_numbers = #tpu.dot_dimension_numbers<[1], [0], [0], [1], [0, 0, 1, 1], [], []>} : vector<4x8xf32>, vector<8x128xf32>, vector<4x128xf32> -> vector<4x128xf32>
    %cst_30 = arith.constant dense<0.000000e+00> : vector<4x128xf32>
    %72 = tpu.matmul %70, %54, %cst_30 {dimension_numbers = #tpu.dot_dimension_numbers<[1], [0], [0], [1], [0, 0, 1, 1], [], []>} : vector<4x8xf32>, vector<8x128xf32>, vector<4x128xf32> -> vector<4x128xf32>
    %73 = arith.maximumf %71, %72 : vector<4x128xf32>
    %c0_31 = arith.constant 0 : index
    %c0_32 = arith.constant 0 : index
    %74 = vector.load %arg6[%c0_31, %c0_32] : memref<384x256xbf16, #tpu.memory_space<vmem>>, vector<384x256xbf16>
    %c0_33 = arith.constant 0 : index
    %c0_34 = arith.constant 0 : index
    %75 = vector.load %arg7[%c0_33, %c0_34] : memref<1x256xf32, #tpu.memory_space<vmem>>, vector<1x256xf32>
    %cst_35 = arith.constant 0.000000e+00 : f32
    %76 = vector.broadcast %cst_35 : f32 to vector<1x128xf32>
    %77 = tpu.concatenate %76, %73, %76 in 0 : vector<1x128xf32>, vector<4x128xf32>, vector<1x128xf32> -> vector<6x128xf32>
    %78 = vector.extract_strided_slice %77 {offsets = [0, 0], sizes = [4, 128], strides = [1, 1]} : vector<6x128xf32> to vector<4x128xf32>
    %79 = vector.extract_strided_slice %77 {offsets = [1, 0], sizes = [4, 128], strides = [1, 1]} : vector<6x128xf32> to vector<4x128xf32>
    %80 = vector.extract_strided_slice %77 {offsets = [2, 0], sizes = [4, 128], strides = [1, 1]} : vector<6x128xf32> to vector<4x128xf32>
    %81 = tpu.concatenate %78, %79, %80 in 1 : vector<4x128xf32>, vector<4x128xf32>, vector<4x128xf32> -> vector<4x384xf32>
    %82 = arith.truncf %81 : vector<4x384xf32> to vector<4x384xbf16>
    %cst_36 = arith.constant dense<0.000000e+00> : vector<4x256xf32>
    %83 = tpu.matmul %82, %74, %cst_36 {dimension_numbers = #tpu.dot_dimension_numbers<[1], [0], [0], [1], [0, 0, 1, 1], [], []>} : vector<4x384xbf16>, vector<384x256xbf16>, vector<4x256xf32> -> vector<4x256xf32>
    %84 = vector.broadcast %75 : vector<1x256xf32> to vector<4x256xf32>
    %85 = arith.addf %83, %84 : vector<4x256xf32>
    %cst_37 = arith.constant 0.000000e+00 : f32
    %86 = vector.broadcast %cst_37 : f32 to vector<4x256xf32>
    %87 = arith.maximumf %85, %86 : vector<4x256xf32>
    %88 = vector.extract_strided_slice %87 {offsets = [0, 0], sizes = [4, 128], strides = [1, 1]} : vector<4x256xf32> to vector<4x128xf32>
    %89 = vector.extract_strided_slice %87 {offsets = [0, 128], sizes = [4, 128], strides = [1, 1]} : vector<4x256xf32> to vector<4x128xf32>
    %90 = arith.maximumf %88, %89 : vector<4x128xf32>
    %91 = vector.extract_strided_slice %90 {offsets = [0, 0], sizes = [4, 64], strides = [1, 1]} : vector<4x128xf32> to vector<4x64xf32>
    %92 = vector.extract_strided_slice %90 {offsets = [0, 64], sizes = [4, 64], strides = [1, 1]} : vector<4x128xf32> to vector<4x64xf32>
    %93 = arith.maximumf %91, %92 : vector<4x64xf32>
    %cst_38 = arith.constant dense<0xFF800000> : vector<64xf32>
    %94 = vector.multi_reduction <maximumf>, %93, %cst_38 [0] : vector<4x64xf32> to vector<64xf32>
    %95 = vector.shape_cast %94 : vector<64xf32> to vector<1x64xf32>
    %96 = arith.truncf %95 : vector<1x64xf32> to vector<1x64xbf16>
    %c0_39 = arith.constant 0 : index
    %c0_40 = arith.constant 0 : index
    %97 = vector.load %arg8[%c0_39, %c0_40] : memref<64x128xbf16, #tpu.memory_space<vmem>>, vector<64x128xbf16>
    %cst_41 = arith.constant dense<0.000000e+00> : vector<1x128xf32>
    %98 = tpu.matmul %96, %97, %cst_41 {dimension_numbers = #tpu.dot_dimension_numbers<[1], [0], [0], [1], [0, 0, 1, 1], [], []>} : vector<1x64xbf16>, vector<64x128xbf16>, vector<1x128xf32> -> vector<1x128xf32>
    %c0_42 = arith.constant 0 : index
    %c0_43 = arith.constant 0 : index
    %99 = vector.load %arg9[%c0_42, %c0_43] : memref<1x128xf32, #tpu.memory_space<vmem>>, vector<1x128xf32>
    %100 = arith.addf %98, %99 : vector<1x128xf32>
    %c0_44 = arith.constant 0 : index
    %c0_45 = arith.constant 0 : index
    %c0_46 = arith.constant 0 : index
    %101 = vector.load %arg10[%c0_44, %c0_45, %c0_46] : memref<1x1x128xf32, #tpu.memory_space<vmem>>, vector<1x1x128xf32>
    %102 = vector.shape_cast %101 : vector<1x1x128xf32> to vector<1x128xf32>
    %103 = vector.shape_cast %100 : vector<1x128xf32> to vector<1x1x128xf32>
    tpu.vector_store %arg10[%c0_44, %c0_45, %c0_46], %103 {strides = array<i32>} : memref<1x1x128xf32, #tpu.memory_space<vmem>>, vector<1x1x128xf32>,
    return
  }
  func.func @transform_0(%arg0: i32) -> (i32, i32, i32) {
    %c0_i32 = arith.constant 0 : i32
    %c0_i32_0 = arith.constant 0 : i32
    %c0_i32_1 = arith.constant 0 : i32
    return %arg0, %c0_i32, %c0_i32_0 : i32, i32, i32
  }
  func.func @transform_1(%arg0: i32) -> (i32, i32) {
    %c0_i32 = arith.constant 0 : i32
    %c0_i32_0 = arith.constant 0 : i32
    %c0_i32_1 = arith.constant 0 : i32
    return %c0_i32, %c0_i32_0 : i32, i32
  }
  func.func @transform_2(%arg0: i32) -> (i32, i32) {
    %c0_i32 = arith.constant 0 : i32
    %c0_i32_0 = arith.constant 0 : i32
    %c0_i32_1 = arith.constant 0 : i32
    return %c0_i32, %c0_i32_0 : i32, i32
  }
  func.func @transform_3(%arg0: i32) -> (i32, i32) {
    %c0_i32 = arith.constant 0 : i32
    %c0_i32_0 = arith.constant 0 : i32
    %c0_i32_1 = arith.constant 0 : i32
    return %c0_i32, %c0_i32_0 : i32, i32
  }
  func.func @transform_4(%arg0: i32) -> (i32, i32) {
    %c0_i32 = arith.constant 0 : i32
    %c0_i32_0 = arith.constant 0 : i32
    %c0_i32_1 = arith.constant 0 : i32
    return %c0_i32, %c0_i32_0 : i32, i32
  }
  func.func @transform_5(%arg0: i32) -> (i32, i32) {
    %c0_i32 = arith.constant 0 : i32
    %c0_i32_0 = arith.constant 0 : i32
    %c0_i32_1 = arith.constant 0 : i32
    return %c0_i32, %c0_i32_0 : i32, i32
  }
  func.func @transform_6(%arg0: i32) -> (i32, i32) {
    %c0_i32 = arith.constant 0 : i32
    %c0_i32_0 = arith.constant 0 : i32
    %c0_i32_1 = arith.constant 0 : i32
    return %c0_i32, %c0_i32_0 : i32, i32
  }
  func.func @transform_7(%arg0: i32) -> (i32, i32) {
    %c0_i32 = arith.constant 0 : i32
    %c0_i32_0 = arith.constant 0 : i32
    %c0_i32_1 = arith.constant 0 : i32
    return %c0_i32, %c0_i32_0 : i32, i32
  }
  func.func @transform_8(%arg0: i32) -> (i32, i32) {
    %c0_i32 = arith.constant 0 : i32
    %c0_i32_0 = arith.constant 0 : i32
    %c0_i32_1 = arith.constant 0 : i32
    return %c0_i32, %c0_i32_0 : i32, i32
  }
  func.func @transform_9(%arg0: i32) -> (i32, i32, i32) {
    %c0_i32 = arith.constant 0 : i32
    %c0_i32_0 = arith.constant 0 : i32
    %c0_i32_1 = arith.constant 0 : i32
    return %arg0, %c0_i32, %c0_i32_0 : i32, i32, i32
  }
}

</mosaic_0001>

<bundles_post_ra>
// kernel: tile.18
= control target key start
LH: loop header
LB: loop body
LE: loop exit
PB: predicated region body
PF: predicated region fallthrough
CT: control target
= control target key end

     0   :  { %s28_s0 = inlined_call_operand.vmem [shape: f32[16], index: 0, kind: input, shape index: {}]   ;;  %s29_s1 = inlined_call_operand.vmem [shape: f32[16,16], index: 1, kind: output, shape index: {}]  }
   0x1   :  { %v4_v0 = vld [vmem:[%s28_s0] ss:$0 sm:$0xff] }
   0x2   :  { %5 = vst [vmem:[%s29_s1] sm:$0xff] %v4_v0  ;;  %8 = vst [vmem:[%s29_s1 + $0x8] sm:$0xff] %v4_v0 }

// kernel: tile.19
= control target key start
LH: loop header
LB: loop body
LE: loop exit
PB: predicated region body
PF: predicated region fallthrough
CT: control target
= control target key end

     0   :  { %s7_s6 = smov 3  ;;  %s21_s9 = smov 3  ;;  %vm4_vm0 = vcmask 130048   ;;  %vm11_vm1 = vcmask 1048448   ;;  %vm18_vm2 = vcmask 917248   ;;  %vm25_vm3 = vcmask 786048   ;;  %s131_s0 = inlined_call_operand.vmem [shape: f32[16,16], index: 0, kind: input, shape index: {}]   ;;  %s132_s1 = inlined_call_operand.vmem [shape: f32[1,256], index: 1, kind: output, shape index: {}]  }
   0x1   :  { %v69_v0 = vld [vmem:[%s131_s0 + $0x7] ss:$8 sm:%s7_s6]   ;;  %s84_s10 = smov 112   ;;  %v71_v1 = vld [vmem:[%s131_s0 + $0x5] ss:$8 sm:%s21_s9]   ;;  %s14_s13 = smov 3 }
   0x2   :  { %9 = vrot.lane.b32.xlu0 %v69_v0, %s84_s10  ;;  %s85_s14 = smov 80   ;;  %v70_v2 = vld [vmem:[%s131_s0 + $0x6] ss:$8 sm:%s14_s13]   ;;  %s28_s17 = smov 3  ;;  %vm32_vm4 = vcmask 654848   ;;  %vm39_vm5 = vcmask 523648  }
   0x3   :  { %23 = vrot.lane.b32.xlu1 %v71_v1, %s85_s14  ;;  %v72_v3 = vld [vmem:[%s131_s0 + $0x4] ss:$8 sm:%s28_s17]   ;;  %s35_s20 = smov 3  ;;  %s42_s21 = smov 3  ;;  %vm46_vm6 = vcmask 392448   ;;  %vm53_vm7 = vcmask 261248  }
   0x4   :  { %s86_s22 = smov 96   ;;  %s87_s23 = smov 64   ;;  %v73_v4 = vld [vmem:[%s131_s0 + $0x3] ss:$8 sm:%s35_s20]   ;;  %v74_v5 = vld [vmem:[%s131_s0 + $0x2] ss:$8 sm:%s42_s21]  }
   0x5   :  { %s2_s26 = smov 3  ;;  %s49_s29 = smov 3 }
   0x6   :  { %16 = vrot.lane.b32.xlu0 %v70_v2, %s86_s22  ;;  %v3_v6 = vld [vmem:[%s131_s0] ss:$8 sm:%s2_s26]   ;;  %s88_s3 = smov 48   ;;  %s89_s4 = smov 32  }
   0x7   :  { %30 = vrot.lane.b32.xlu1 %v72_v3, %s87_s23  ;;  %5 = vst.msk [vmem:[#allocation0] ss:$8 sm:$0x3] %vm4_vm0, %v3_v6   ;;  %v75_v7 = vld [vmem:[%s131_s0 + $0x1] ss:$8 sm:%s49_s29]   ;;  %s90_s0 = smov 16  }
   0xa   :  { %37 = vrot.lane.b32.xlu0 %v73_v4, %s88_s3 }
   0xb   :  { %44 = vrot.lane.b32.xlu1 %v74_v5, %s89_s4 }
   0xe   :  { %51 = vrot.lane.b32.xlu0 %v75_v7, %s90_s0 }
  0x74   :  { %v10_v8 = vpop.permute.xlu0 %9  }
  0x75   :  { %12 = vst.msk [vmem:[#allocation0] ss:$8 sm:$0x3] %vm11_vm1, %v10_v8   ;;  %v24_v9 = vpop.permute.xlu1 %23  }
  0x78   :  { %v17_v10 = vpop.permute.xlu0 %16  }
  0x79   :  { %19 = vst.msk [vmem:[#allocation0] ss:$8 sm:$0x3] %vm18_vm2, %v17_v10   ;;  %v31_v11 = vpop.permute.xlu1 %30  }
  0x7a   :  { %26 = vst.msk [vmem:[#allocation0] ss:$8 sm:$0x3] %vm25_vm3, %v24_v9  }
  0x7b   :  { %33 = vst.msk [vmem:[#allocation0] ss:$8 sm:$0x3] %vm32_vm4, %v31_v11  }
  0x7c   :  { %v38_v12 = vpop.permute.xlu0 %37  }
  0x7d   :  { %40 = vst.msk [vmem:[#allocation0] ss:$8 sm:$0x3] %vm39_vm5, %v38_v12   ;;  %v45_v13 = vpop.permute.xlu1 %44  }
  0x7e   :  { %47 = vst.msk [vmem:[#allocation0] ss:$8 sm:$0x3] %vm46_vm6, %v45_v13  }
  0x80   :  { %v52_v14 = vpop.permute.xlu0 %51  }
  0x81   :  { %54 = vst.msk [vmem:[#allocation0] ss:$8 sm:$0x3] %vm53_vm7, %v52_v14  }
  0x88   :  { %v59_v15 = vld [vmem:[#allocation0] sm:$0x1]  ;;  %v64_v16 = vld [vmem:[#allocation0 + $0x8] sm:$0x1] }
  0x89   :  { %62 = vst [vmem:[%s132_s1] sm:$0x1] %v59_v15  ;;  %76 = vst [vmem:[%s132_s1 + $0x1] sm:$0x1] %v64_v16 }

// kernel: tile.23
= control target key start
LH: loop header
LB: loop body
LE: loop exit
PB: predicated region body
PF: predicated region fallthrough
CT: control target
= control target key end

     0   :  { %s22_s0 = inlined_call_operand.vmem [shape: f32[32], index: 0, kind: input, shape index: {}]   ;;  %s23_s1 = inlined_call_operand.vmem [shape: f32[8,32], index: 1, kind: output, shape index: {}]  }
   0x1   :  { %v4_v0 = vld [vmem:[%s22_s0] ss:$0 sm:$0xff] }
   0x2   :  { %5 = vst [vmem:[%s23_s1] sm:$0xff] %v4_v0 }

// kernel: tile.28
= control target key start
LH: loop header
LB: loop body
LE: loop exit
PB: predicated region body
PF: predicated region fallthrough
CT: control target
= control target key end

     0   :  { %s22_s0 = inlined_call_operand.vmem [shape: f32[64], index: 0, kind: input, shape index: {}]   ;;  %s23_s1 = inlined_call_operand.vmem [shape: f32[4,64], index: 1, kind: output, shape index: {}]  }
   0x1   :  { %v4_v0 = vld [vmem:[%s22_s0] ss:$0 sm:$0xff] }
   0x2   :  { %5 = vst [vmem:[%s23_s1] sm:$0xf] %v4_v0 }

// kernel: tile.24
= control target key start
LH: loop header
LB: loop body
LE: loop exit
PB: predicated region body
PF: predicated region fallthrough
CT: control target
= control target key end

     0   :  { %s7_s6 = smov 3  ;;  %s14_s9 = smov 3  ;;  %vm4_vm0 = vcmask 261120   ;;  %vm11_vm1 = vcmask 1048320   ;;  %vm18_vm2 = vcmask 785920   ;;  %vm25_vm3 = vcmask 523520   ;;  %s79_s0 = inlined_call_operand.vmem [shape: f32[8,32], index: 0, kind: input, shape index: {}]   ;;  %s80_s1 = inlined_call_operand.vmem [shape: f32[1,256], index: 1, kind: output, shape index: {}]  }
   0x1   :  { %v41_v0 = vld [vmem:[%s79_s0 + $0x3] ss:$4 sm:%s7_s6]   ;;  %s48_s10 = smov 96   ;;  %s21_s11 = smov 3  ;;  %v42_v1 = vld [vmem:[%s79_s0 + $0x2] ss:$4 sm:%s14_s9]  }
   0x2   :  { %9 = vrot.lane.b32.xlu0 %v41_v0, %s48_s10  ;;  %v43_v2 = vld [vmem:[%s79_s0 + $0x1] ss:$4 sm:%s21_s11]   ;;  %s2_s16 = smov 3  ;;  %s49_s17 = smov 32  }
   0x3   :  { %23 = vrot.lane.b32.xlu1 %v43_v2, %s49_s17  ;;  %v3_v3 = vld [vmem:[%s79_s0] ss:$4 sm:%s2_s16]   ;;  %s50_s0 = smov 64  }
   0x4   :  { %5 = vst.msk [vmem:[#allocation0] ss:$8 sm:$0x3] %vm4_vm0, %v3_v3  }
   0x6   :  { %16 = vrot.lane.b32.xlu0 %v42_v1, %s50_s0 }
  0x74   :  { %v10_v4 = vpop.permute.xlu0 %9  }
  0x75   :  { %12 = vst.msk [vmem:[#allocation0] ss:$8 sm:$0x3] %vm11_vm1, %v10_v4   ;;  %v24_v5 = vpop.permute.xlu1 %23  }
  0x78   :  { %v17_v6 = vpop.permute.xlu0 %16  }
  0x79   :  { %19 = vst.msk [vmem:[#allocation0] ss:$8 sm:$0x3] %vm18_vm2, %v17_v6  }
  0x7a   :  { %26 = vst.msk [vmem:[#allocation0] ss:$8 sm:$0x3] %vm25_vm3, %v24_v5  }
  0x81   :  { %v31_v7 = vld [vmem:[#allocation0] sm:$0x1]  ;;  %v36_v8 = vld [vmem:[#allocation0 + $0x8] sm:$0x1] }
  0x82   :  { %34 = vst [vmem:[%s80_s1] sm:$0x1] %v31_v7  ;;  %44 = vst [vmem:[%s80_s1 + $0x1] sm:$0x1] %v36_v8 }

// kernel: tile.29
= control target key start
LH: loop header
LB: loop body
LE: loop exit
PB: predicated region body
PF: predicated region fallthrough
CT: control target
= control target key end

     0   :  { %s7_s8 = smov 3  ;;  %vm9_vm0 = vcmask 523264   ;;  %s34_s9 = smov 64   ;;  %vm16_vm1 = vcmask 1048064   ;;  %s54_s0 = inlined_call_operand.vmem [shape: f32[4,64], index: 0, kind: input, shape index: {}]   ;;  %s55_s1 = inlined_call_operand.vmem [shape: f32[1,256], index: 1, kind: output, shape index: {}]  }
   0x1   :  { %v5_v0 = vld [vmem:[%s54_s0] sm:$0xf]  ;;  %s12_s0 = smov 3 }
   0x2   :  { %6 = vst [vmem:[#allocation1] sm:$0xf] %v5_v0 }
   0x9   :  { %v13_v1 = vld [vmem:[#allocation1 + $0x1] ss:$2 sm:%s12_s0]   ;;  %v8_v2 = vld [vmem:[#allocation1] ss:$2 sm:%s7_s8]  }
   0xa   :  { %14 = vrot.lane.b32.xlu0 %v13_v1, %s34_s9  ;;  %10 = vst.msk [vmem:[#allocation0] ss:$8 sm:$0x3] %vm9_vm0, %v8_v2  }
  0x7c   :  { %v15_v3 = vpop.permute.xlu0 %14  }
  0x7d   :  { %17 = vst.msk [vmem:[#allocation0] ss:$8 sm:$0x3] %vm16_vm1, %v15_v3  }
  0x84   :  { %v22_v4 = vld [vmem:[#allocation0] sm:$0x1]  ;;  %v27_v5 = vld [vmem:[#allocation0 + $0x8] sm:$0x1] }
  0x85   :  { %25 = vst [vmem:[%s55_s1] sm:$0x1] %v22_v4  ;;  %32 = vst [vmem:[%s55_s1 + $0x1] sm:$0x1] %v27_v5 }

// kernel: flexible_convnet_forward.1
= control target key start
LH: loop header
LB: loop body
LE: loop exit
PB: predicated region body
PF: predicated region fallthrough
CT: control target
= control target key end

     0   :  { %14 = vsyncpa [#allocation3], 0  ;;  %s2744_s0 = inlined_call_operand.vmem [shape: f32[2,16,16], index: 0, kind: input, shape index: {}]   ;;  %s2745_s1 = inlined_call_operand.vmem [shape: bf16[48,256], index: 1, kind: input, shape index: {}]   ;;  %s2746_s2 = inlined_call_operand.vmem [shape: f32[1,256], index: 2, kind: input, shape index: {}]   ;;  %s2747_s3 = inlined_call_operand.vmem [shape: bf16[384,256], index: 3, kind: input, shape index: {}]   ;;  %s2748_s4 = inlined_call_operand.vmem [shape: f32[1,256], index: 4, kind: input, shape index: {}]   ;;  %s2749_s5 = inlined_call_operand.vmem [shape: bf16[384,256], index: 5, kind: input, shape index: {}]   ;;  %s2750_s6 = inlined_call_operand.vmem [shape: f32[1,256], index: 6, kind: input, shape index: {}]   ;;  %s2751_s7 = inlined_call_operand.vmem [shape: bf16[64,128], index: 7, kind: input, shape index: {}]   ;;  %s2752_s8 = inlined_call_operand.vmem [shape: f32[1,128], index: 8, kind: input, shape index: {}]   ;;  %s2753_s9 = inlined_call_operand.hbm [shape: f32[2,1,128], index: 9, kind: output, shape index: {}]  }
   0x1   :  { %16 = vsyncpa [#allocation3 + $0x1], 0  ;;  %s2255_s30 = smov 0   ;;  %s2257_s10 = smov 0  }
   0x2   :  { %s2259_s11 = smov 0   ;;  %s2261_s12 = smov 0  }
   0x3 LB: > { %s2276_s13 = sadd.s32 4294967295, %s2196_s12   ;;  %s1743_s14 = sadd.s32 4294967294, %s2196_s12   ;;  %s2196_s12 = sphi %s2261_s12, %s2759_s12   ;;  %s2192_s11 = sphi %s2259_s11, %s2758_s11   ;;  %s2188_s10 = sphi %s2257_s10, %s2757_s10   ;;  %s2184_s30 = sphi %s2255_s30, %s2756_s30  }
   0x4   : > { %s2280_s15 = sadd.s32 1, %s2196_s12   ;;  %s223_s16 = sadd.s32 1, %s2192_s11 }
   0x5   : > { %s220_s17 = ssub.s32 %s2196_s12, %s2280_s15  ;;  %p233_p0 = scmp.ne.s32.totalorder %s2192_s11, %s2188_s10 }
   0x6   : > { %p221_p1 = scmp.eq.s32.totalorder %s220_s17, 0  ;;  %p234_p2 = scmp.eq.s32.totalorder %s2276_s13, 1 }
   0x7   : > { %p239_p3 = scmp.ne.s32.totalorder %s2188_s10, %s2184_s30  ;;  %p240_p4 = scmp.eq.s32.totalorder %s1743_s14, 1 }
   0x8   : > { %s2291_s18 = scalar_select %p221_p1, %s2192_s11, %s223_s16  }
   0x9   : > { %p2293_p5 = por %p234_p2, %p233_p0  ;;  %p2297_p6 = por %p240_p4, %p239_p3 }
   0xa   : > { %p1746_p7 = scmp.ge.s32.totalorder %s2196_s12, 1  ;;  %p290_p8 = scmp.lt.s32.totalorder %s2196_s12, 3 }
   0xc   : > { %p291_p9 = pnand %p1746_p7, %p290_p8 }
   0xd   : > { %p325_p10 = scmp.lt.s32.totalorder (!%p291_p9), %s2276_s13, 1  ;;  %s2200_s27 = smov (!%p291_p9), 32  }
   0xe   : > { %294 = sbr.rel (%p291_p9) target bundleno = 1528 (0x5f8), region = 56  ;;  %s323_s16 = sand.u32 (!%p291_p9), 1, %s2188_s10  }
   0xf   : > { %s1869_s22 = sshll.u32 (!%p291_p9), %s2276_s13, 4  ;;  %s324_s23 = scalar_lea.vmem (!%p291_p9), [#allocation2], %s323_s16 }
  0x10   : > { %s1688_s24 = sshll.u32 (!%p291_p9), %s324_s23, 4  ;;  %s1676_s28 = scalar_lea.sflag (!%p291_p9), [#allocation3], %s323_s16  ;;  %s2705_s24 = int_to_ptr.vmem [resolvable:$true] %s1688_s24 }
  0x11   : > { %s2136_s29 = scalar_lea.vmem (!%p291_p9), %s2705_s24, 16 }
  0x12   : > { %p2137_p11 = scmp.ne.s32.totalorder (!%p291_p9), %s2705_s24, %s2136_s29 }
  0x13   : > { %v1979_v0 = vld [vmem:[%s2745_s1 + $0x24] ss:$8 sps:$4 sm:$0xff]   ;;  %v1981_v1 = vld [vmem:[%s2745_s1 + $0x20] ss:$8 sps:$4 sm:$0xff]   ;;  %s326_s25 = scalar_select %p325_p10, %s2276_s13, 1  ;;  %vm342_vm0 = vcmask 1040384   ;;  %v385_v48 = vlaneseq }
  0x14   : > { %v1982_v2 = vld [vmem:[%s2745_s1 + $0x14] ss:$8 sps:$4 sm:$0xff]   ;;  %439 = vmatprep.subr.bf16.mxu0 %v1979_v0  ;;  %v1984_v3 = vld [vmem:[%s2745_s1 + $0x10] ss:$8 sps:$4 sm:$0xff]   ;;  %v1985_v4 = vld [vmem:[%s2745_s1 + $0x4] ss:$8 sps:$4 sm:$0xff]   ;;  %p2138_p12 = pnand %p2137_p11, %p2293_p5 }
  0x15   : > { %s1872_s14 = sshll.u32 %s326_s25, 4  ;;  %440 = vmatpush1.bf16.msra.mxu0 %v1981_v1  ;;  %v1987_v7 = vld [vmem:[%s2745_s1] ss:$8 sps:$4 sm:$0xff]   ;;  %vm353_vm1 = vcmask 1046528   ;;  %vm365_vm2 = vcmask 1045504   ;;  %v2198_v17 = vmov 0   ;;  %vm1806_vm9 = vmneg %vm342_vm0 }
  0x16   : > { %s329_s21 = scalar_lea.vmem %s2744_s0, %s1872_s14  ;;  %441 = vmatprep.subr.bf16.mxu0 %v1982_v2  ;;  %461 = vmatprep.mubr.bf16.mxu0 %v2198_v17  ;;  %s2199_s25 = smov 16   ;;  %vm377_vm3 = vcmask 130048   ;;  %vm380_vm4 = vcmask 261120   ;;  %vm425_vm5 = vcmask 392192   ;;  %v2201_v37 = vmov 0.0   ;;  %vm1808_vm10 = vmpackc.low %vm1806_vm9, %vm1806_vm9 }
  0x17   : > { %v331_v5 = vld [vmem:[%s329_s21] sm:$0xff]  ;;  %v332_v6 = vld [vmem:[%s329_s21 + $0x8] sm:$0xff]  ;;  %1888 = vmatprep.subr.mxu1 %v2201_v37  ;;  %vm2202_vm6 = vmmov 0   ;;  %v2012_v38 = vld [vmem:[%s2747_s3 + $0x170] ss:$8 sps:$4 sm:$0xff]   ;;  %v386_v49 = vshrl.u32 %v385_v48, 7  ;;  %p2139_p13 = pneg %p2138_p12 }
  0x18   : > { %v343_v8 = vrot.slane %v331_v5, 7  ;;  %v344_v9 = vrot.slane %v332_v6, 7  ;;  %1892 = vmatprep.mubr.msk.f32.mxu1 %vm2202_vm6, %v2201_v37  ;;  %v2014_v39 = vld [vmem:[%s2747_s3 + $0x174] ss:$8 sps:$4 sm:$0xff]   ;;  %v2018_v40 = vld [vmem:[%s2747_s3 + $0x160] ss:$8 sps:$4 sm:$0xff]  }
  0x19   : > { %442 = vmatpush1.bf16.msra.mxu0 %v1984_v3  ;;  %v2020_v41 = vld [vmem:[%s2747_s3 + $0x164] ss:$8 sps:$4 sm:$0xff]   ;;  %v2024_v42 = vld [vmem:[%s2747_s3 + $0x150] ss:$8 sps:$4 sm:$0xff]   ;;  %v2026_v43 = vld [vmem:[%s2747_s3 + $0x154] ss:$8 sps:$4 sm:$0xff]  }
  0x1a   : > { %v345_v10 = vsel %vm342_vm0, %v343_v8, %v344_v9  ;;  %v349_v11 = vsel %vm342_vm0, 0.0, %v343_v8  ;;  %v350_v12 = vsel %vm342_vm0, %v344_v9, 0.0  ;;  %443 = vmatprep.subr.bf16.mxu0 %v1985_v4  ;;  %v2030_v44 = vld [vmem:[%s2747_s3 + $0x140] ss:$8 sps:$4 sm:$0xff]   ;;  %v2032_v45 = vld [vmem:[%s2747_s3 + $0x144] ss:$8 sps:$4 sm:$0xff]  }
  0x1b   : > { %v354_v13 = vrot.slane %v349_v11, 1  ;;  %v355_v14 = vrot.slane %v345_v10, 1  ;;  %v357_v15 = vrot.slane %v350_v12, 1  ;;  %v369_v16 = vrot.slane %v350_v12, 2  ;;  %v2036_v46 = vld [vmem:[%s2747_s3 + $0x130] ss:$8 sps:$4 sm:$0xff]  }
  0x1c   : > { %v366_v18 = vrot.slane %v349_v11, 2  ;;  %v367_v19 = vrot.slane %v345_v10, 2  ;;  %v2038_v47 = vld [vmem:[%s2747_s3 + $0x134] ss:$8 sps:$4 sm:$0xff]   ;;  %v2370_v50 = vsub.s32 1, %v386_v49  ;;  %v2372_v51 = vsub.s32 0, %v386_v49 }
  0x1d   : > { %v356_v20 = vsel %vm353_vm1, %v354_v13, %v355_v14  ;;  %v358_v21 = vsel %vm353_vm1, %v355_v14, %v357_v15  ;;  %444 = vmatpush1.bf16.msra.mxu0 %v1987_v7  ;;  %v339_v52 = vld [vmem:[%s2746_s2] sm:$0x3]  ;;  %v481_v61 = vand.u32 127, %v385_v48  ;;  %v482_v62 = vmul.u32 2, %v386_v49  ;;  %v1990_v9 = vld [vmem:[%s2747_s3 + $0x74] ss:$8 sps:$4 sm:$0xff]  }
  0x1e   : > { %v1969_v22 = vpack.i.bf16 %v358_v21, %v356_v20  ;;  %v368_v23 = vsel %vm365_vm2, %v366_v18, %v367_v19  ;;  %v370_v24 = vsel %vm365_vm2, %v367_v19, %v369_v16  ;;  %994 = vmatprep.subr.bf16.mxu0 %v2014_v39  ;;  %v392_v54 = vrot.slane %v339_v52, %v2370_v50  ;;  %v1993_v12 = vld [vmem:[%s2747_s3 + $0x64] ss:$8 sps:$4 sm:$0xff]   ;;  %v1991_v13 = vld [vmem:[%s2747_s3 + $0x60] ss:$8 sps:$4 sm:$0xff]   ;;  %v1996_v14 = vld [vmem:[%s2747_s3 + $0x54] ss:$8 sps:$4 sm:$0xff]  }
  0x1f   : > { %v1974_v25 = vpack.i.bf16 %v370_v24, %v368_v23  ;;  %v388_v56 = vrot.slane %v339_v52, %v2372_v51  ;;  %vm483_vm7 = vcmp.eq.s32.totalorder %v481_v61, %v482_v62  ;;  %v485_v4 = vadd.s32 1, %v482_v62  ;;  %v1994_v15 = vld [vmem:[%s2747_s3 + $0x50] ss:$8 sps:$4 sm:$0xff]   ;;  %v1999_v16 = vld [vmem:[%s2747_s3 + $0x44] ss:$8 sps:$4 sm:$0xff]   ;;  %s2203_s14 = smov 64  }
  0x20   : > { %1970 = vrot.lane.b32.xlu0 %v1969_v22, %s2199_s25  ;;  %v2380_v8 = vsel %vm483_vm7, 1.0, %v2201_v37  ;;  %v1997_v18 = vld [vmem:[%s2747_s3 + $0x40] ss:$8 sps:$4 sm:$0xff]   ;;  %v2002_v19 = vld [vmem:[%s2747_s3 + $0x34] ss:$8 sps:$4 sm:$0xff]   ;;  %vm1038_vm11 = vcmask 64512  }
  0x21   : > { %vm486_vm8 = vcmp.eq.s32.totalorder %v481_v61, %v485_v4  ;;  %v2000_v20 = vld [vmem:[%s2747_s3 + $0x30] ss:$8 sps:$4 sm:$0xff]   ;;  %v2005_v21 = vld [vmem:[%s2747_s3 + $0x24] ss:$8 sps:$4 sm:$0xff]   ;;  %v2003_v22 = vld [vmem:[%s2747_s3 + $0x20] ss:$8 sps:$4 sm:$0xff]  }
  0x22   : > { %v2008_v23 = vld [vmem:[%s2747_s3 + $0x14] ss:$8 sps:$4 sm:$0xff]   ;;  %v2006_v24 = vld [vmem:[%s2747_s3 + $0x10] ss:$8 sps:$4 sm:$0xff]   ;;  %v2042_v39 = vld [vmem:[%s2747_s3 + $0x120] ss:$8 sps:$4 sm:$0xff]  }
  0x23   : > { %v2057_v48 = vld [vmem:[%s2747_s3 + $0x80] ss:$8 sps:$4 sm:$0xff]   ;;  %v2059_v49 = vld [vmem:[%s2747_s3 + $0x84] ss:$8 sps:$4 sm:$0xff]   ;;  %vm1237_vm12 = vcmask 1044480   ;;  %vm1588_vm14 = vcmask 519168  }
  0x24   : > { %1975 = vrot.lane.b32.xlu0 %v1974_v25, %s2200_s27  ;;  %v2011_v25 = vld [vmem:[%s2747_s3 + $0x4] ss:$8 sps:$4 sm:$0xff]   ;;  %vm1861_vm13 = vmpackc.low %vm1237_vm12, %vm1237_vm12  ;;  %vm1630_vm15 = vcmask 523264   ;;  %s2703_s27 = scalar_lea.hbm %s2753_s9, %s1869_s22  ;;  %s2204_s13 = smov [#allocation2]  }
  0x92   : > { %v1971_v26 = vpop.permute.xlu0 %1970 }
  0x93   : > { %v1973_v27 = vunpack.i.h.bf16 %v1971_v26  ;;  %v1972_v28 = vunpack.i.l.bf16 %v1971_v26  ;;  %v2009_v26 = vld [vmem:[%s2747_s3] ss:$8 sps:$4 sm:$0xff]  }
  0x95   : > { %v379_v32 = vsel %vm377_vm3, %v345_v10, %v1973_v27  ;;  %v378_v33 = vsel %vm377_vm3, %v349_v11, %v1972_v28  ;;  %v2392_v10 = vsel %vm486_vm8, 1.0, %v2201_v37  ;;  %v1988_v11 = vld [vmem:[%s2747_s3 + $0x70] ss:$8 sps:$4 sm:$0xff]   ;;  %v2017_v27 = vld [vmem:[%s2747_s3 + $0xf4] ss:$8 sps:$4 sm:$0xff]  }
  0x96   : > { %v1976_v29 = vpop.permute.xlu0 %1975  ;;  %v2015_v28 = vld [vmem:[%s2747_s3 + $0xf0] ss:$8 sps:$4 sm:$0xff]  }
  0x97   : > { %v1978_v30 = vunpack.i.h.bf16 %v1976_v29  ;;  %v1977_v31 = vunpack.i.l.bf16 %v1976_v29  ;;  %v2023_v29 = vld [vmem:[%s2747_s3 + $0xe4] ss:$8 sps:$4 sm:$0xff]  }
  0x99   : > { %v381_v34 = vsel %vm380_vm4, %v378_v33, %v1977_v31  ;;  %v382_v35 = vsel %vm380_vm4, %v379_v32, %v1978_v30  ;;  %v2021_v30 = vld [vmem:[%s2747_s3 + $0xe0] ss:$8 sps:$4 sm:$0xff]   ;;  %v2029_v31 = vld [vmem:[%s2747_s3 + $0xd4] ss:$8 sps:$4 sm:$0xff]   ;;  %v2027_v32 = vld [vmem:[%s2747_s3 + $0xd0] ss:$8 sps:$4 sm:$0xff]  }
  0x9a   : > { %v383_v36 = vpack.c.bf16 %v382_v35, %v381_v34  ;;  %v2035_v33 = vld [vmem:[%s2747_s3 + $0xc4] ss:$8 sps:$4 sm:$0xff]   ;;  %v2033_v34 = vld [vmem:[%s2747_s3 + $0xc0] ss:$8 sps:$4 sm:$0xff]   ;;  %v2041_v35 = vld [vmem:[%s2747_s3 + $0xb4] ss:$8 sps:$4 sm:$0xff]  }
  0x9c   : > { %1755 = vmatmul.mubr.msk.bf16.vlgmr.msra.gmra.mxu0 %vm425_vm5, %v383_v36  ;;  %v2039_v36 = vld [vmem:[%s2747_s3 + $0xb0] ss:$8 sps:$4 sm:$0xff]  }
  0x9d   : > { %1026 = vmatprep.mubr.bf16.mxu0 %v2198_v17  ;;  %995 = vmatpush1.bf16.msra.mxu0 %v2012_v38  ;;  %v2044_v38 = vld [vmem:[%s2747_s3 + $0x124] ss:$8 sps:$4 sm:$0xff]  }
  0x9e   : > { %996 = vmatprep.subr.bf16.mxu0 %v2020_v41  ;;  %v2045_v41 = vld [vmem:[%s2747_s3 + $0xa0] ss:$8 sps:$4 sm:$0xff]  }
  0xa1   : > { %997 = vmatpush1.bf16.msra.mxu0 %v2018_v40  ;;  %v2047_v40 = vld [vmem:[%s2747_s3 + $0xa4] ss:$8 sps:$4 sm:$0xff]  }
  0xa2   : > { %998 = vmatprep.subr.bf16.mxu0 %v2026_v43  ;;  %v2048_v43 = vld [vmem:[%s2747_s3 + $0x110] ss:$8 sps:$4 sm:$0xff]  }
  0xa5   : > { %999 = vmatpush1.bf16.msra.mxu0 %v2024_v42  ;;  %v2050_v42 = vld [vmem:[%s2747_s3 + $0x114] ss:$8 sps:$4 sm:$0xff]  }
  0xa6   : > { %1000 = vmatprep.subr.bf16.mxu0 %v2032_v45  ;;  %v2051_v45 = vld [vmem:[%s2747_s3 + $0x90] ss:$8 sps:$4 sm:$0xff]  }
  0xa9   : > { %1001 = vmatpush1.bf16.msra.mxu0 %v2030_v44  ;;  %v2053_v44 = vld [vmem:[%s2747_s3 + $0x94] ss:$8 sps:$4 sm:$0xff]  }
  0xaa   : > { %1002 = vmatprep.subr.bf16.mxu0 %v2038_v47  ;;  %v2054_v47 = vld [vmem:[%s2747_s3 + $0x100] ss:$8 sps:$4 sm:$0xff]  }
  0xad   : > { %1003 = vmatpush1.bf16.msra.mxu0 %v2036_v46  ;;  %v2056_v46 = vld [vmem:[%s2747_s3 + $0x104] ss:$8 sps:$4 sm:$0xff]  }
  0xae   : > { %1004 = vmatprep.subr.bf16.mxu0 %v2044_v38  ;;  %v2065_v38 = vld [vmem:[%s2749_s5 + $0x64] ss:$8 sps:$4 sm:$0xff]  }
  0xb1   : > { %1005 = vmatpush1.bf16.msra.mxu0 %v2042_v39  ;;  %v2068_v39 = vld [vmem:[%s2749_s5 + $0x54] ss:$8 sps:$4 sm:$0xff]  }
  0xb2   : > { %1006 = vmatprep.subr.bf16.mxu0 %v2050_v42  ;;  %v2074_v42 = vld [vmem:[%s2749_s5 + $0x34] ss:$8 sps:$4 sm:$0xff]  }
  0xb5   : > { %1007 = vmatpush1.bf16.msra.mxu0 %v2048_v43  ;;  %v2072_v43 = vld [vmem:[%s2749_s5 + $0x30] ss:$8 sps:$4 sm:$0xff]  }
  0xb6   : > { %1008 = vmatprep.subr.bf16.mxu0 %v2056_v46  ;;  %v2080_v46 = vld [vmem:[%s2749_s5 + $0x14] ss:$8 sps:$4 sm:$0xff]  }
  0xb9   : > { %1009 = vmatpush1.bf16.msra.mxu0 %v2054_v47  ;;  %v2078_v47 = vld [vmem:[%s2749_s5 + $0x10] ss:$8 sps:$4 sm:$0xff]  }
  0xba   : > { %1902 = vmatprep.subr.mxu0 %v2201_v37 }
 0x15c   : > { %v463_v53 = vpop.f32.mrf.mxu0 }
 0x15d   : > { %v464_v63 = vadd.f32 %v463_v53, %v388_v56 }
 0x15e   : > { %v465_v55 = vpop.f32.mrf.mxu0 }
 0x15f   : > { %v466_v58 = vadd.f32 %v465_v55, %v392_v54  ;;  %v472_v5 = vmax.f32 %v464_v63, 0.0 }
 0x160   : > { %v467_v57 = vpop.f32.mrf.mxu0 }
 0x161   : > { %v468_v59 = vadd.f32 %v467_v57, %v388_v56  ;;  %v473_v1 = vmax.f32 %v466_v58, 0.0 }
 0x162   : > { %v469_v60 = vpop.f32.mrf.mxu0 }
 0x163   : > { %v470_v0 = vadd.f32 %v469_v60, %v392_v54  ;;  %v474_v2 = vmax.f32 %v468_v59, 0.0  ;;  %v476_v7 = vmax.f32 %v472_v5, %v473_v1  ;;  %v2084_v5 = vld [vmem:[%s2749_s5 + $0x170] ss:$8 sps:$4 sm:$0xff]  }
 0x165   : > { %v475_v3 = vmax.f32 %v470_v0, 0.0 }
 0x167   : > { %v477_v6 = vmax.f32 %v474_v2, %v475_v3 }
 0x169   : > { %1889 = vmatpush3.msra.mxu1 %v477_v6 }
 0x16a   : > { %1890 = vmatprep.subr.mxu1 %v2201_v37 }
 0x16b   : > { %1891 = vmatpush3.msra.mxu1 %v476_v7 }
 0x16c   : > { %1893 = vmatmul.mubr.msk.f32.vlgmr.msra.gmra.mxu1 %vm377_vm3, %v2380_v8  ;;  %1895 = vmatprep.subr.mxu1 %v2201_v37 }
 0x16d   : > { %1896 = vmatpush3.msra.mxu1 %v477_v6  ;;  %1899 = vmatprep.mubr.msk.f32.mxu1 %vm2202_vm6, %v2201_v37  ;;  %v2086_v6 = vld [vmem:[%s2749_s5 + $0x174] ss:$8 sps:$4 sm:$0xff]  }
 0x16e   : > { %1897 = vmatprep.subr.mxu1 %v2201_v37 }
 0x16f   : > { %1898 = vmatpush3.msra.mxu1 %v476_v7  ;;  %v2090_v7 = vld [vmem:[%s2749_s5 + $0x160] ss:$8 sps:$4 sm:$0xff]  }
 0x170   : > { %1900 = vmatmul.mubr.msk.f32.vlgmr.msra.gmra.mxu1 %vm377_vm3, %v2392_v10  ;;  %953 = vmatprep.subr.bf16.mxu1 %v1990_v9  ;;  %v2092_v9 = vld [vmem:[%s2749_s5 + $0x164] ss:$8 sps:$4 sm:$0xff]  }
 0x171   : > { %954 = vmatpush1.bf16.msra.mxu1 %v1988_v11  ;;  %v2098_v11 = vld [vmem:[%s2749_s5 + $0x154] ss:$8 sps:$4 sm:$0xff]  }
 0x172   : > { %955 = vmatprep.subr.bf16.mxu1 %v1993_v12  ;;  %v2102_v12 = vld [vmem:[%s2749_s5 + $0x140] ss:$8 sps:$4 sm:$0xff]  }
 0x175   : > { %956 = vmatpush1.bf16.msra.mxu1 %v1991_v13  ;;  %v2104_v13 = vld [vmem:[%s2749_s5 + $0x144] ss:$8 sps:$4 sm:$0xff]  }
 0x176   : > { %957 = vmatprep.subr.bf16.mxu1 %v1996_v14  ;;  %v2108_v14 = vld [vmem:[%s2749_s5 + $0x130] ss:$8 sps:$4 sm:$0xff]  }
 0x179   : > { %958 = vmatpush1.bf16.msra.mxu1 %v1994_v15  ;;  %v2110_v15 = vld [vmem:[%s2749_s5 + $0x134] ss:$8 sps:$4 sm:$0xff]  }
 0x17a   : > { %959 = vmatprep.subr.bf16.mxu1 %v1999_v16  ;;  %v683_v16 = vld [vmem:[%s2748_s4] sm:$0x3] }
 0x17d   : > { %960 = vmatpush1.bf16.msra.mxu1 %v1997_v18  ;;  %v706_v18 = vrot.slane %v683_v16, %v2372_v51 }
 0x17e   : > { %961 = vmatprep.subr.bf16.mxu1 %v2002_v19 }
 0x181   : > { %962 = vmatpush1.bf16.msra.mxu1 %v2000_v20  ;;  %v710_v20 = vrot.slane %v683_v16, %v2370_v50 }
 0x182   : > { %963 = vmatprep.subr.bf16.mxu1 %v2005_v21 }
 0x185   : > { %964 = vmatpush1.bf16.msra.mxu1 %v2003_v22 }
 0x186   : > { %965 = vmatprep.subr.bf16.mxu1 %v2008_v23 }
 0x189   : > { %966 = vmatpush1.bf16.msra.mxu1 %v2006_v24 }
 0x18a   : > { %967 = vmatprep.subr.bf16.mxu1 %v2011_v25 }
 0x18d   : > { %968 = vmatpush1.bf16.msra.mxu1 %v2009_v26 }
 0x18e   : > { %969 = vmatprep.subr.bf16.mxu1 %v2017_v27 }
 0x191   : > { %970 = vmatpush2.bf16.msra.mxu1 %v2015_v28 }
 0x192   : > { %971 = vmatprep.subr.bf16.mxu1 %v2023_v29 }
 0x195   : > { %972 = vmatpush2.bf16.msra.mxu1 %v2021_v30 }
 0x196   : > { %973 = vmatprep.subr.bf16.mxu1 %v2029_v31 }
 0x199   : > { %974 = vmatpush2.bf16.msra.mxu1 %v2027_v32 }
 0x19a   : > { %975 = vmatprep.subr.bf16.mxu1 %v2035_v33 }
 0x19d   : > { %976 = vmatpush2.bf16.msra.mxu1 %v2033_v34 }
 0x19e   : > { %977 = vmatprep.subr.bf16.mxu1 %v2041_v35  ;;  %v2062_v35 = vld [vmem:[%s2749_s5 + $0x74] ss:$8 sps:$4 sm:$0xff]  }
 0x1a1   : > { %978 = vmatpush2.bf16.msra.mxu1 %v2039_v36  ;;  %v2060_v36 = vld [vmem:[%s2749_s5 + $0x70] ss:$8 sps:$4 sm:$0xff]  }
 0x1a2   : > { %979 = vmatprep.subr.bf16.mxu1 %v2047_v40  ;;  %v2066_v40 = vld [vmem:[%s2749_s5 + $0x50] ss:$8 sps:$4 sm:$0xff]  }
 0x1a5   : > { %980 = vmatpush2.bf16.msra.mxu1 %v2045_v41  ;;  %v2069_v41 = vld [vmem:[%s2749_s5 + $0x40] ss:$8 sps:$4 sm:$0xff]  }
 0x1a6   : > { %981 = vmatprep.subr.bf16.mxu1 %v2053_v44  ;;  %v2077_v44 = vld [vmem:[%s2749_s5 + $0x24] ss:$8 sps:$4 sm:$0xff]  }
 0x1a9   : > { %982 = vmatpush2.bf16.msra.mxu1 %v2051_v45  ;;  %v2075_v45 = vld [vmem:[%s2749_s5 + $0x20] ss:$8 sps:$4 sm:$0xff]  }
 0x1aa   : > { %983 = vmatprep.subr.bf16.mxu1 %v2059_v49  ;;  %v2081_v49 = vld [vmem:[%s2749_s5] ss:$8 sps:$4 sm:$0xff]  }
 0x1ad   : > { %984 = vmatpush2.bf16.msra.mxu1 %v2057_v48  ;;  %v2083_v48 = vld [vmem:[%s2749_s5 + $0x4] ss:$8 sps:$4 sm:$0xff]  }
 0x1ae   : > { %1539 = vmatprep.subr.bf16.mxu1 %v2086_v6  ;;  %v2128_v6 = vld [vmem:[%s2749_s5 + $0x104] ss:$8 sps:$4 sm:$0xff]  }
 0x22c   : > { %v557_v52 = vpop.f32.mrf.mxu1 }
 0x22e   : > { %v1894_v53 = vpop.f32.mrf.mxu1 }
 0x22f   : > { %v2087_v53 = vld [vmem:[%s2749_s5 + $0xf0] ss:$8 sps:$4 sm:$0xff]  }
 0x230   : > { %v630_v54 = vpop.f32.mrf.mxu1 }
 0x231   : > { %v634_v55 = vmax.f32 %v557_v52, %v630_v54  ;;  %v2089_v52 = vld [vmem:[%s2749_s5 + $0xf4] ss:$8 sps:$4 sm:$0xff]   ;;  %v2095_v54 = vld [vmem:[%s2749_s5 + $0xe4] ss:$8 sps:$4 sm:$0xff]  }
 0x232   : > { %v1901_v56 = vpop.f32.mrf.mxu1 }
 0x233   : > { %v685_v57 = vrot.slane %v634_v55, 7  ;;  %v2093_v55 = vld [vmem:[%s2749_s5 + $0xe0] ss:$8 sps:$4 sm:$0xff]   ;;  %v2101_v56 = vld [vmem:[%s2749_s5 + $0xd4] ss:$8 sps:$4 sm:$0xff]  }
 0x235   : > { %v687_v58 = vsel %vm342_vm0, 0.0, %v685_v57  ;;  %v688_v59 = vsel %vm342_vm0, %v685_v57, 0.0  ;;  %v1809_v4 = vpack.c.bf16 %v685_v57, %v685_v57  ;;  %v2099_v57 = vld [vmem:[%s2749_s5 + $0xd0] ss:$8 sps:$4 sm:$0xff]  }
 0x236   : > { %v691_v60 = vrot.slane %v687_v58, 1  ;;  %v692_v61 = vrot.slane %v688_v59, 1  ;;  %v695_v62 = vrot.slane %v687_v58, 2  ;;  %v696_v63 = vrot.slane %v688_v59, 2  ;;  %v2107_v58 = vld [vmem:[%s2749_s5 + $0xc4] ss:$8 sps:$4 sm:$0xff]  }
 0x237   : > { %v2105_v59 = vld [vmem:[%s2749_s5 + $0xc0] ss:$8 sps:$4 sm:$0xff]  }
 0x238   : > { %v693_v0 = vsel %vm353_vm1, %v691_v60, %v692_v61  ;;  %v697_v1 = vsel %vm365_vm2, %v695_v62, %v696_v63  ;;  %v2113_v60 = vld [vmem:[%s2749_s5 + $0xb4] ss:$8 sps:$4 sm:$0xff]   ;;  %v2111_v61 = vld [vmem:[%s2749_s5 + $0xb0] ss:$8 sps:$4 sm:$0xff]   ;;  %v2116_v62 = vld [vmem:[%s2749_s5 + $0x124] ss:$8 sps:$4 sm:$0xff]  }
 0x239   : > { %v700_v2 = vpack.c.bf16 %v693_v0, %v693_v0  ;;  %v701_v3 = vpack.c.bf16 %v697_v1, %v697_v1  ;;  %v2114_v63 = vld [vmem:[%s2749_s5 + $0x120] ss:$8 sps:$4 sm:$0xff]   ;;  %v2119_v0 = vld [vmem:[%s2749_s5 + $0xa4] ss:$8 sps:$4 sm:$0xff]  }
 0x23a   : > { %v2117_v1 = vld [vmem:[%s2749_s5 + $0xa0] ss:$8 sps:$4 sm:$0xff]  }
 0x23b   : > { %985 = vmatprep.mubr.bf16.mxu1 %v700_v2  ;;  %1027 = vmatmul.mubr.bf16.vlgmr.msra.gmra.mxu0 %v701_v3  ;;  %v2122_v2 = vld [vmem:[%s2749_s5 + $0x114] ss:$8 sps:$4 sm:$0xff]   ;;  %v2120_v3 = vld [vmem:[%s2749_s5 + $0x110] ss:$8 sps:$4 sm:$0xff]  }
 0x23c   : > { %1810 = vmatmul.mubr.msk.bf16.vlgmr.msra.gmra.mxu1 %vm1808_vm10, %v1809_v4  ;;  %1904 = vmatprep.mubr.msk.f32.mxu0 %vm2202_vm6, %v2201_v37  ;;  %v2125_v4 = vld [vmem:[%s2749_s5 + $0x94] ss:$8 sps:$4 sm:$0xff]  }
 0x23d   : > { %1571 = vmatprep.mubr.bf16.mxu1 %v2198_v17  ;;  %1540 = vmatpush1.bf16.msra.mxu1 %v2084_v5  ;;  %v2096_v17 = vld [vmem:[%s2749_s5 + $0x150] ss:$8 sps:$4 sm:$0xff]  }
 0x23e   : > { %1541 = vmatprep.subr.bf16.mxu1 %v2092_v9  ;;  %v2123_v5 = vld [vmem:[%s2749_s5 + $0x90] ss:$8 sps:$4 sm:$0xff]   ;;  %v2131_v9 = vld [vmem:[%s2749_s5 + $0x84] ss:$8 sps:$4 sm:$0xff]  }
 0x241   : > { %1542 = vmatpush1.bf16.msra.mxu1 %v2090_v7  ;;  %v2126_v7 = vld [vmem:[%s2749_s5 + $0x100] ss:$8 sps:$4 sm:$0xff]  }
 0x242   : > { %1543 = vmatprep.subr.bf16.mxu1 %v2098_v11 }
 0x245   : > { %1544 = vmatpush1.bf16.msra.mxu1 %v2096_v17  ;;  %v2129_v17 = vld [vmem:[%s2749_s5 + $0x80] ss:$8 sps:$4 sm:$0xff]  }
 0x246   : > { %1545 = vmatprep.subr.bf16.mxu1 %v2104_v13 }
 0x249   : > { %1546 = vmatpush1.bf16.msra.mxu1 %v2102_v12 }
 0x24a   : > { %1547 = vmatprep.subr.bf16.mxu1 %v2110_v15 }
 0x24d   : > { %1548 = vmatpush1.bf16.msra.mxu1 %v2108_v14 }
 0x24e   : > { %1549 = vmatprep.subr.bf16.mxu1 %v2116_v62 }
 0x251   : > { %1550 = vmatpush1.bf16.msra.mxu1 %v2114_v63 }
 0x252   : > { %1551 = vmatprep.subr.bf16.mxu1 %v2122_v2 }
 0x255   : > { %1552 = vmatpush1.bf16.msra.mxu1 %v2120_v3 }
 0x256   : > { %1553 = vmatprep.subr.bf16.mxu1 %v2128_v6 }
 0x259   : > { %1554 = vmatpush1.bf16.msra.mxu1 %v2126_v7 }
 0x25a   : > { %1912 = vmatprep.subr.bf16.mxu1 %v2201_v37 }
 0x2fb   : > { %v1028_v19 = vpop.f32.mrf.mxu0 }
 0x2fc   : > { %v987_v21 = vpop.f32.mrf.mxu1 }
 0x2fd   : > { %v988_v22 = vadd.f32 %v987_v21, %v706_v18  ;;  %v1030_v23 = vpop.f32.mrf.mxu0 }
 0x2fe   : > { %v989_v24 = vpop.f32.mrf.mxu1 }
 0x2ff   : > { %v1029_v25 = vadd.f32 %v1028_v19, %v988_v22  ;;  %v990_v26 = vadd.f32 %v989_v24, %v710_v20  ;;  %v1032_v27 = vpop.f32.mrf.mxu0 }
 0x300   : > { %v991_v28 = vpop.f32.mrf.mxu1  ;;  %v2132_v27 = vld [vmem:[%s2751_s7 + $0x18] sm:$0xff]  }
 0x301   : > { %v1031_v29 = vadd.f32 %v1030_v23, %v990_v26  ;;  %v1033_v30 = vpop.f32.mrf.mxu0  ;;  %v1035_v32 = vmax.f32 %v1029_v25, 0.0  ;;  %v1232_v25 = vld [vmem:[%s2750_s6] sm:$0x3] }
 0x302   : > { %v992_v31 = vpop.f32.mrf.mxu1  ;;  %v1251_v26 = vrot.slane %v1232_v25, %v2372_v51 }
 0x303   : > { %v1036_v33 = vmax.f32 %v1031_v29, 0.0  ;;  %v1255_v29 = vrot.slane %v1232_v25, %v2370_v50 }
 0x305   : > { %v1037_v34 = vmax.f32 %v1035_v32, %v1036_v33 }
 0x307   : > { %1903 = vmatpush3.msra.mxu0 %v1037_v34 }
 0x308   : > { %1905 = vmatmul.mubr.msk.f32.vlgmr.msra.gmra.mxu0 %vm1038_vm11, %v2380_v8  ;;  %1907 = vmatprep.subr.mxu0 %v2201_v37  ;;  %v2063_v8 = vld [vmem:[%s2749_s5 + $0x60] ss:$8 sps:$4 sm:$0xff]  }
 0x309   : > { %1908 = vmatpush3.msra.mxu0 %v1037_v34  ;;  %1909 = vmatprep.mubr.msk.f32.mxu0 %vm2202_vm6, %v2201_v37  ;;  %v2133_v34 = vld [vmem:[%s2751_s7 + $0x10] sm:$0xff]  }
 0x30a   : > { %1498 = vmatprep.subr.bf16.mxu0 %v2062_v35 }
 0x30c   : > { %1910 = vmatmul.mubr.msk.f32.vlgmr.msra.gmra.mxu0 %vm1038_vm11, %v2392_v10  ;;  %v2071_v10 = vld [vmem:[%s2749_s5 + $0x44] ss:$8 sps:$4 sm:$0xff]  }
 0x30d   : > { %1499 = vmatpush1.bf16.msra.mxu0 %v2060_v36 }
 0x30e   : > { %1500 = vmatprep.subr.bf16.mxu0 %v2065_v38 }
 0x311   : > { %1501 = vmatpush1.bf16.msra.mxu0 %v2063_v8 }
 0x312   : > { %1502 = vmatprep.subr.bf16.mxu0 %v2068_v39 }
 0x315   : > { %1503 = vmatpush1.bf16.msra.mxu0 %v2066_v40  ;;  %v2134_v40 = vld [vmem:[%s2751_s7 + $0x8] sm:$0xff]  }
 0x316   : > { %1504 = vmatprep.subr.bf16.mxu0 %v2071_v10 }
 0x319   : > { %1505 = vmatpush1.bf16.msra.mxu0 %v2069_v41 }
 0x31a   : > { %1506 = vmatprep.subr.bf16.mxu0 %v2074_v42 }
 0x31d   : > { %1507 = vmatpush1.bf16.msra.mxu0 %v2072_v43  ;;  %v2135_v43 = vld [vmem:[%s2751_s7] sm:$0xff]  }
 0x31e   : > { %1508 = vmatprep.subr.bf16.mxu0 %v2077_v44 }
 0x321   : > { %1509 = vmatpush1.bf16.msra.mxu0 %v2075_v45 }
 0x322   : > { %1510 = vmatprep.subr.bf16.mxu0 %v2080_v46 }
 0x325   : > { %1511 = vmatpush1.bf16.msra.mxu0 %v2078_v47 }
 0x326   : > { %1512 = vmatprep.subr.bf16.mxu0 %v2083_v48 }
 0x329   : > { %1513 = vmatpush1.bf16.msra.mxu0 %v2081_v49 }
 0x32a   : > { %1514 = vmatprep.subr.bf16.mxu0 %v2089_v52 }
 0x32d   : > { %1515 = vmatpush2.bf16.msra.mxu0 %v2087_v53 }
 0x32e   : > { %1516 = vmatprep.subr.bf16.mxu0 %v2095_v54 }
 0x331   : > { %1517 = vmatpush2.bf16.msra.mxu0 %v2093_v55  ;;  %v1605_v55 = vld [vmem:[%s2752_s8] sm:$0x1] }
 0x332   : > { %1518 = vmatprep.subr.bf16.mxu0 %v2101_v56 }
 0x335   : > { %1519 = vmatpush2.bf16.msra.mxu0 %v2099_v57 }
 0x336   : > { %1520 = vmatprep.subr.bf16.mxu0 %v2107_v58 }
 0x339   : > { %1521 = vmatpush2.bf16.msra.mxu0 %v2105_v59 }
 0x33a   : > { %1522 = vmatprep.subr.bf16.mxu0 %v2113_v60 }
 0x33d   : > { %1523 = vmatpush2.bf16.msra.mxu0 %v2111_v61 }
 0x33e   : > { %1524 = vmatprep.subr.bf16.mxu0 %v2119_v0 }
 0x341   : > { %1525 = vmatpush2.bf16.msra.mxu0 %v2117_v1 }
 0x342   : > { %1526 = vmatprep.subr.bf16.mxu0 %v2125_v4 }
 0x345   : > { %1527 = vmatpush2.bf16.msra.mxu0 %v2123_v5 }
 0x346   : > { %1528 = vmatprep.subr.bf16.mxu0 %v2131_v9 }
 0x349   : > { %1529 = vmatpush2.bf16.msra.mxu0 %v2129_v17 }
 0x3c8   : > { %v1107_v11 = vpop.f32.mrf.mxu0 }
 0x3ca   : > { %v1906_v12 = vpop.f32.mrf.mxu0 }
 0x3cc   : > { %v1179_v13 = vpop.f32.mrf.mxu0 }
 0x3cd   : > { %v1183_v14 = vmax.f32 %v1107_v11, %v1179_v13 }
 0x3ce   : > { %v1911_v15 = vpop.f32.mrf.mxu0 }
 0x3cf   : > { %v1234_v16 = vrot.slane %v1183_v14, 7 }
 0x3d1   : > { %v1236_v18 = vsel %vm342_vm0, 0.0, %v1234_v16 }
 0x3d2   : > { %v1238_v19 = vsel %vm1237_vm12, %v1236_v18, 0.0  ;;  %v1862_v24 = vpack.c.bf16 %v1236_v18, %v1236_v18 }
 0x3d3   : > { %v1242_v20 = vrot.slane %v1238_v19, 2  ;;  %v1240_v21 = vrot.slane %v1238_v19, 1 }
 0x3d5   : > { %v1246_v22 = vpack.c.bf16 %v1242_v20, %v1242_v20  ;;  %v1245_v23 = vpack.c.bf16 %v1240_v21, %v1240_v21 }
 0x3d7   : > { %1530 = vmatprep.mubr.bf16.mxu0 %v1245_v23  ;;  %1572 = vmatmul.mubr.bf16.vlgmr.msra.gmra.mxu1 %v1246_v22 }
 0x3d8   : > { %1863 = vmatmul.mubr.msk.bf16.vlgmr.msra.gmra.mxu0 %vm1861_vm13, %v1862_v24  ;;  %1920 = vmatprep.mubr.msk.bf16.mxu1 %vm2202_vm6, %v2201_v37 }
 0x3d9   : > { %1913 = vmatpush3.bf16.msra.mxu1 %v2132_v27 }
 0x3da   : > { %1914 = vmatprep.subr.bf16.mxu1 %v2201_v37 }
 0x3dd   : > { %1915 = vmatpush3.bf16.msra.mxu1 %v2133_v34 }
 0x3de   : > { %1916 = vmatprep.subr.bf16.mxu1 %v2201_v37 }
 0x3e1   : > { %1917 = vmatpush3.bf16.msra.mxu1 %v2134_v40 }
 0x3e2   : > { %1918 = vmatprep.subr.bf16.mxu1 %v2201_v37 }
 0x3e5   : > { %1919 = vmatpush3.bf16.msra.mxu1 %v2135_v43 }
 0x497   : > { %v1573_v28 = vpop.f32.mrf.mxu1 }
 0x498   : > { %v1532_v30 = vpop.f32.mrf.mxu0 }
 0x499   : > { %v1533_v31 = vadd.f32 %v1532_v30, %v1251_v26  ;;  %v1575_v32 = vpop.f32.mrf.mxu1 }
 0x49a   : > { %v1534_v33 = vpop.f32.mrf.mxu0 }
 0x49b   : > { %v1574_v35 = vadd.f32 %v1573_v28, %v1533_v31  ;;  %v1535_v51 = vadd.f32 %v1534_v33, %v1255_v29  ;;  %v1577_v36 = vpop.f32.mrf.mxu1 }
 0x49c   : > { %v1536_v38 = vpop.f32.mrf.mxu0 }
 0x49d   : > { %v1576_v8 = vadd.f32 %v1575_v32, %v1535_v51  ;;  %v1578_v39 = vpop.f32.mrf.mxu1  ;;  %v1580_v10 = vmax.f32 %v1574_v35, 0.0 }
 0x49e   : > { %v1537_v50 = vpop.f32.mrf.mxu0 }
 0x49f   : > { %v1581_v41 = vmax.f32 %v1576_v8, 0.0 }
 0x4a1   : > { %v1582_v42 = vmax.f32 %v1580_v10, %v1581_v41 }
 0x4a3   : > { %1584 = vrot.lane.b32.xlu1 %v1582_v42, %s2203_s14  ;;  %s2140_s14 = sshll.u32 %s2204_s13, 4  ;;  %s2141_s14 = int_to_ptr.vmem [resolvable:$false] %s2140_s14 }
 0x4a4   : > { %s2142_s17 = scalar_lea.vmem %s2141_s14, 32  ;;  %p2143_p0 = scmp.lt.s32.totalorder %s2705_s24, %s2141_s14 }
 0x4a5   : > { %p2144_p1 = scmp.lt.s32.totalorder %s2142_s17, %s2136_s29 }
 0x4a7   : > { %p2145_p2 = por %p2144_p1, %p2143_p0 }
 0x4a9   : > { %p2146_p3 = pnand %p2145_p2, %p2139_p13 }
 0x515   : > { %v1585_v44 = vpop.permute.xlu1 %1584 }
 0x516   : > { %v1587_v45 = vmax.f32 %v1582_v42, %v1585_v44 }
 0x518   : > { %v1589_v46 = vsel %vm1588_vm14, %v1587_v45, -inf }
 0x519   : > { %v1590_v47 = vrot.slane %v1589_v46, 4 }
 0x51b   : > { %v1591_v48 = vmax.f32 %v1589_v46, %v1590_v47 }
 0x51d   : > { %v1592_v49 = vrot.slane %v1591_v48, 2 }
 0x51f   : > { %v1593_v52 = vmax.f32 %v1591_v48, %v1592_v49 }
 0x521   : > { %v1594_v53 = vrot.slane %v1593_v52, 1 }
 0x523   : > { %v1595_v54 = vmax.f32 %v1593_v52, %v1594_v53 }
 0x525   : > { %v1596_v37 = vpack.c.bf16 %v1595_v54, %v1595_v54 }
 0x527   : > { %1921 = vmatmul.mubr.msk.bf16.vlgmr.msra.gmra.mxu1 %vm1630_vm15, %v1596_v37 }
 0x5e7   : > { %v1668_v56 = vpop.f32.mrf.mxu1 }
 0x5e8   : > { %v1669_v57 = vadd.f32 %v1668_v56, %v1605_v55 }
 0x5e9   : > { %v1922_v58 = vpop.f32.mrf.mxu1 }
 0x5ea   : > { %1674 = vst [vmem:[%s324_s23] sm:$0x1] %v1669_v57 }
 0x5eb   : > { %v1671_v59 = vpop.f32.mrf.mxu1 }
 0x5ec   : > { %2149 = shalt.err (!%p2146_p3)
}
 0x5ed   : > { %s2150_s21 = scalar_lea.hbm %s2703_s27, 16  ;;  %s2154_s23 = scalar_lea.hbm %s2753_s9, 32 }
 0x5ee   : > { %p2151_p4 = scmp.ne.s32.totalorder %s2703_s27, %s2150_s21  ;;  %p2155_p9 = scmp.lt.s32.totalorder %s2703_s27, %s2753_s9 }
 0x5ef   : > { %p2156_p10 = scmp.lt.s32.totalorder %s2154_s23, %s2150_s21 }
 0x5f0   : > { %p2152_p7 = pnand %p2151_p4, %p2293_p5 }
 0x5f1   : > { %p2157_p11 = por %p2156_p10, %p2155_p9 }
 0x5f2   : > { %p2153_p8 = pneg %p2152_p7 }
 0x5f4   : > { %p2158_p12 = pnand %p2157_p11, %p2153_p8 }
 0x5f6   : > { %2161 = shalt.err (!%p2158_p12)
}
 0x5f7   : > { %1924 = dma.vmem_to_hbm [thread:$0]  (%p2293_p5), %s2705_s24, 16, %s2703_s27, %s1676_s28   ;;  %v1923_v60 = vpop.f32.mrf.mxu1 }
 0x5f8 PF: > { %p1930_p13 = scmp.ge.s32.totalorder %s2196_s12, 2  ;;  %s1700_s29 = sand.u32 1, %s2184_s30  }
 0x5f9   : > { %s1701_s13 = scalar_lea.sflag [#allocation3], %s1700_s29 }
 0x5fa   : > { %p1927_p0 = pnand %p1930_p13, %p2297_p6 }
 0x5fc   : > { %p1928_p1 = pneg %p1927_p0 }
 0x5fe   : > { %2179 = dma.done.wait (%p1928_p1), %s1701_s13, 16  }
 0x5ff   : > { %2181 = vsyncadd (%p1928_p1), %s1701_s13, 4294967280  ;;  %p19_p2 = scmp.ge.s32.totalorder %s2280_s15, 4   ;;  %s2756_s30 = smov %s2188_s10 }
 0x600   : > { %s2757_s10 = smov %s2192_s11  ;;  %s2758_s11 = smov %s2291_s18 }
 0x601   : > { %s2759_s12 = smov %s2280_s15  ;;  %21 = sbr.rel (!%p19_p2) target bundleno = 3 (0x3), region = 91 }
 0x606   :  { %1705 = vsyncpa [#allocation3], 1 }
 0x607   :  { %1707 = vsyncpa [#allocation3 + $0x1], 1 }

</bundles_post_ra>
